<compile_context>
chip_gen: v7x
topology: tpu7x:2x2x1
jax: 0.10.0
libtpu: 0.0.40
codegen_flags: <defaults>
</compile_context>

<pallas_src>
import functools

import jax
import jax.numpy as jnp
from jax import lax
from jax.experimental import pallas as pl
from jax.experimental.pallas import tpu as pltpu

SMOOTH = 1.0
LANE = 128
_DEFAULT_VMEM_BYTES = 64 << 20      # conservative fallback (v7x per-TC VMEM)


def _vmem_capacity_bytes():
    try:
        return int(pltpu.get_tpu_info().vmem_capacity_bytes)
    except Exception:  # pragma: no cover - fallback if query unavailable
        return _DEFAULT_VMEM_BYTES


def _dice_kernel(x_ref, t_ref, inter_ref, union_ref, *,
                 rows_total, block_rows, needs_mask, out_rows):
    """Grid = (batch_blocks, row_chunks); row_chunks is the reduction axis.

    Accumulates per-lane (and per-sublane when 8-aligned) f32 partial sums
    into the resident output blocks."""
    k = pl.program_id(1)

    @pl.when(k == 0)
    def _init():
        inter_ref[...] = jnp.zeros_like(inter_ref)
        union_ref[...] = jnp.zeros_like(union_ref)

    x = x_ref[...].astype(jnp.float32)   # (bb, block_rows, 128)
    t = t_ref[...].astype(jnp.float32)

    def _accumulate(xv, tv):
        bb = xv.shape[0]
        xt = xv * tv
        sq = xv * xv + tv * tv
        if out_rows == 8:
            # Sum whole (8,128) vregs along the leading group axis: pure VALU
            # adds, no XLU sublane reduce, vreg-aligned accumulator update.
            xt = xt.reshape(bb, block_rows // 8, 8, LANE)
            sq = sq.reshape(bb, block_rows // 8, 8, LANE)
            inter_ref[...] += jnp.sum(xt, axis=1)
            union_ref[...] += jnp.sum(sq, axis=1)
        else:
            inter_ref[...] += jnp.sum(xt, axis=1, keepdims=True)
            union_ref[...] += jnp.sum(sq, axis=1, keepdims=True)

    if needs_mask:
        last = pl.num_programs(1) - 1

        @pl.when(k != last)
        def _full_chunk():
            _accumulate(x, t)

        @pl.when(k == last)
        def _ragged_chunk():
            # Rows at/after `valid` are out-of-bounds garbage in this block.
            valid = rows_total - k * block_rows
            row_ids = lax.broadcasted_iota(jnp.int32, x.shape, 1)
            keep = row_ids < valid
            _accumulate(jnp.where(keep, x, 0.0), jnp.where(keep, t, 0.0))
    else:
        _accumulate(x, t)


@functools.partial(jax.jit, static_argnames=("block_rows",))
def dice_loss(inputs, target, block_rows=None):
    assert inputs.shape == target.shape
    b = inputs.shape[0]

    # Keep the original dtype in HBM; the kernel upcasts per block in VMEM.
    x = inputs.reshape(b, -1)
    t = target.reshape(b, -1)
    n = x.shape[1]

    dsize = jnp.dtype(inputs.dtype).itemsize
    # Dtype-aware sublane granularity: (8,128) f32, (16,128) bf16, (32,128) i8.
    mult = max(8, 32 // dsize)

    # Minimal lane alignment: pad only to the next multiple of 128 (zeros are
    # sum-neutral); no pad op at all when C*H*W is already 128-aligned.
    r = pl.cdiv(n, LANE)
    n_lane = r * LANE
    if n_lane != n:
        x = jnp.pad(x, ((0, 0), (0, n_lane - n)))
        t = jnp.pad(t, ((0, 0), (0, n_lane - n)))

    x3 = x.reshape(b, r, LANE)
    t3 = t.reshape(b, r, LANE)

    # --- block sizing, from the f32 working set ------------------------------
    vmem_cap = _vmem_capacity_bytes()
    target_block_bytes = (8 << 20) if vmem_cap >= (96 << 20) else (4 << 20)
    f32_budget = min(target_block_bytes, vmem_cap // 16)

    if block_rows is None:
        rb = max(mult, (f32_budget // (LANE * 4)) // mult * mult)
    else:
        rb = int(block_rows)
        assert rb >= r or rb % mult == 0, (
            f"block_rows must be a multiple of {mult} for dtype {inputs.dtype}")
    if rb >= r:
        rb = r                       # single chunk: block spans the full extent
    n_chunks = pl.cdiv(r, rb)
    needs_mask = (r % rb) != 0

    # Small-sample path: pack several batch samples per grid step when a whole
    # sample fits in one block (amortizes per-step + DMA-issue overhead).
    bb = 1
    if n_chunks == 1:
        max_bb = max(1, f32_budget // max(1, rb * LANE * 4))
        for d in range(min(b, max_bb), 0, -1):
            if b % d == 0:
                bb = d
                break

    # 8-sublane-wide accumulators whenever the block rows are 8-aligned.
    out_rows = 8 if rb % 8 == 0 else 1

    # VMEM limit: input double-buffers (original dtype) + the f32 temporaries
    # the kernel materializes + resident accumulators + headroom.
    in_block_bytes = bb * rb * LANE * dsize
    f32_block_bytes = bb * rb * LANE * 4
    acc_bytes = 2 * 2 * bb * out_rows * LANE * 4
    vmem_needed = (2 * 2 * in_block_bytes + 4 * f32_block_bytes
                   + acc_bytes + (8 << 20))
    vmem_limit = int(min(max(vmem_needed, 32 << 20), int(vmem_cap * 0.9)))

    kernel = functools.partial(_dice_kernel, rows_total=r, block_rows=rb,
                               needs_mask=needs_mask, out_rows=out_rows)

    cost = pl.CostEstimate(
        flops=6 * b * r * LANE,
        transcendentals=0,
        bytes_accessed=2 * b * r * LANE * dsize + 2 * b * out_rows * LANE * 4,
    )

    inter_part, union_part = pl.pallas_call(
        kernel,
        out_shape=(
            jax.ShapeDtypeStruct((b, out_rows, LANE), jnp.float32),
            jax.ShapeDtypeStruct((b, out_rows, LANE), jnp.float32),
        ),
        grid_spec=pltpu.PrefetchScalarGridSpec(
            num_scalar_prefetch=0,
            grid=(b // bb, n_chunks),
            in_specs=[
                pl.BlockSpec((bb, rb, LANE), lambda bi, k: (bi, k, 0)),
                pl.BlockSpec((bb, rb, LANE), lambda bi, k: (bi, k, 0)),
            ],
            out_specs=(
                pl.BlockSpec((bb, out_rows, LANE), lambda bi, k: (bi, 0, 0)),
                pl.BlockSpec((bb, out_rows, LANE), lambda bi, k: (bi, 0, 0)),
            ),
        ),
        compiler_params=pltpu.CompilerParams(
            dimension_semantics=("parallel", "arbitrary"),
            vmem_limit_bytes=vmem_limit,
        ),
        cost_estimate=cost,
    )(x3, t3)

    # Tiny tail: 8->1 sublane + cross-lane reduce, dice formula, batch mean.
    intersect = jnp.sum(inter_part, axis=(1, 2))
    union = jnp.sum(union_part, axis=(1, 2))
    loss = 1.0 - (2.0 * intersect + SMOOTH) / (union + SMOOTH)
    return jnp.mean(loss)


def _dice_loss_ref(inputs, target):
    inputs = inputs.astype(jnp.float32)
    target = target.astype(jnp.float32)
    axes = tuple(range(1, inputs.ndim))
    intersect = jnp.sum(inputs * target, axis=axes)
    union = jnp.sum(inputs ** 2, axis=axes) + jnp.sum(target ** 2, axis=axes)
    loss = 1.0 - (2.0 * intersect + SMOOTH) / (union + SMOOTH)
    return jnp.mean(loss)


if __name__ == "__main__":
    key = jax.random.PRNGKey(0)
    k1, k2 = jax.random.split(key)

    # 1) NCHW f32 segmentation-style inputs (lane-aligned, batch-packed path).
    x = jax.nn.sigmoid(jax.random.normal(k1, (2, 4, 16, 16), dtype=jnp.float32))
    y = (jax.random.uniform(k2, (2, 4, 16, 16)) > 0.5).astype(jnp.float32)
    loss = jax.block_until_ready(dice_loss(x, y))
    ref = jax.block_until_ready(_dice_loss_ref(x, y))
    assert jnp.allclose(loss, ref, rtol=1e-5, atol=1e-5), (loss, ref)

    # 2) Multi-chunk + ragged (masked-last-chunk-only) path:
    #    N = 5*16*16 = 1280 -> r = 10 lane rows, block_rows=8 -> 2 chunks.
    x2 = jax.nn.sigmoid(jax.random.normal(k1, (2, 5, 16, 16), dtype=jnp.float32))
    y2 = (jax.random.uniform(k2, (2, 5, 16, 16)) > 0.5).astype(jnp.float32)
    loss2 = jax.block_until_ready(dice_loss(x2, y2, block_rows=8))
    ref2 = jax.block_until_ready(_dice_loss_ref(x2, y2))
    assert jnp.allclose(loss2, ref2, rtol=1e-5, atol=1e-5), (loss2, ref2)

    # 3) bf16 inputs (dtype-aware (16,128) blocks, f32 in-kernel accumulation):
    #    N = 20*16*16 = 5120 -> r = 40, block_rows=16 -> 3 chunks (ragged).
    x3 = jax.nn.sigmoid(
        jax.random.normal(k1, (2, 20, 16, 16), dtype=jnp.float32)
    ).astype(jnp.bfloat16)
    y3 = (jax.random.uniform(k2, (2, 20, 16, 16)) > 0.5).astype(jnp.bfloat16)
    loss3 = jax.block_until_ready(dice_loss(x3, y3, block_rows=16))
    ref3 = jax.block_until_ready(_dice_loss_ref(x3, y3))
    assert jnp.allclose(loss3, ref3, rtol=1e-4, atol=1e-4), (loss3, ref3)

    print("KERNEL_OK")
</pallas_src>

<mosaic_0001>
module attributes {stable_mosaic.version = 11 : i64} {
  func.func @_dice_kernel(%arg0: i32, %arg1: i32, %arg2: memref<2x8x128xf32, #tpu.memory_space<vmem>>, %arg3: memref<2x8x128xf32, #tpu.memory_space<vmem>>, %arg4: memref<2x8x128xf32, #tpu.memory_space<vmem>>, %arg5: memref<2x8x128xf32, #tpu.memory_space<vmem>>) attributes {dimension_semantics = [#tpu.dimension_semantics<parallel>, #tpu.dimension_semantics<arbitrary>], iteration_bounds = array<i64: 1, 1>, scalar_prefetch = 0 : i64, scratch_operands = 0 : i64, tpu.core_type = #tpu.core_type<tc>, window_params = [{transform_indices = @transform_0, window_bounds = array<i64: 2, 8, 128>}, {transform_indices = @transform_1, window_bounds = array<i64: 2, 8, 128>}, {transform_indices = @transform_2, window_bounds = array<i64: 2, 8, 128>}, {transform_indices = @transform_3, window_bounds = array<i64: 2, 8, 128>}]} {
    %c0_i32 = arith.constant 0 : i32
    %0 = arith.cmpi eq, %arg1, %c0_i32 : i32
    %1 = arith.extui %0 : i1 to i32
    %c0_i32_0 = arith.constant 0 : i32
    %2 = arith.cmpi ne, %1, %c0_i32_0 : i32
    scf.if %2 {
      %cst_19 = arith.constant 0.000000e+00 : f32
      %19 = vector.broadcast %cst_19 : f32 to vector<2x8x128xf32>
      %c0_20 = arith.constant 0 : index
      %c0_21 = arith.constant 0 : index
      %c0_22 = arith.constant 0 : index
      %20 = vector.load %arg4[%c0_20, %c0_21, %c0_22] : memref<2x8x128xf32, #tpu.memory_space<vmem>>, vector<2x8x128xf32>
      tpu.vector_store %arg4[%c0_20, %c0_21, %c0_22], %19 {strides = array<i32>} : memref<2x8x128xf32, #tpu.memory_space<vmem>>, vector<2x8x128xf32>,
      %cst_23 = arith.constant 0.000000e+00 : f32
      %21 = vector.broadcast %cst_23 : f32 to vector<2x8x128xf32>
      %c0_24 = arith.constant 0 : index
      %c0_25 = arith.constant 0 : index
      %c0_26 = arith.constant 0 : index
      %22 = vector.load %arg5[%c0_24, %c0_25, %c0_26] : memref<2x8x128xf32, #tpu.memory_space<vmem>>, vector<2x8x128xf32>
      tpu.vector_store %arg5[%c0_24, %c0_25, %c0_26], %21 {strides = array<i32>} : memref<2x8x128xf32, #tpu.memory_space<vmem>>, vector<2x8x128xf32>,
    } else {
    }
    %c0 = arith.constant 0 : index
    %c0_1 = arith.constant 0 : index
    %c0_2 = arith.constant 0 : index
    %3 = vector.load %arg2[%c0, %c0_1, %c0_2] : memref<2x8x128xf32, #tpu.memory_space<vmem>>, vector<2x8x128xf32>
    %c0_3 = arith.constant 0 : index
    %c0_4 = arith.constant 0 : index
    %c0_5 = arith.constant 0 : index
    %4 = vector.load %arg3[%c0_3, %c0_4, %c0_5] : memref<2x8x128xf32, #tpu.memory_space<vmem>>, vector<2x8x128xf32>
    %5 = arith.mulf %3, %4 : vector<2x8x128xf32>
    %6 = arith.mulf %3, %3 : vector<2x8x128xf32>
    %7 = arith.mulf %4, %4 : vector<2x8x128xf32>
    %8 = arith.addf %6, %7 : vector<2x8x128xf32>
    %9 = vector.shape_cast %5 : vector<2x8x128xf32> to vector<2x1x8x128xf32>
    %10 = vector.shape_cast %8 : vector<2x8x128xf32> to vector<2x1x8x128xf32>
    %c0_6 = arith.constant 0 : index
    %c0_7 = arith.constant 0 : index
    %c0_8 = arith.constant 0 : index
    %11 = vector.load %arg4[%c0_6, %c0_7, %c0_8] : memref<2x8x128xf32, #tpu.memory_space<vmem>>, vector<2x8x128xf32>
    %cst = arith.constant dense<0.000000e+00> : vector<2x8x128xf32>
    %12 = vector.multi_reduction <add>, %9, %cst [1] : vector<2x1x8x128xf32> to vector<2x8x128xf32>
    %13 = arith.addf %11, %12 : vector<2x8x128xf32>
    %c0_9 = arith.constant 0 : index
    %c0_10 = arith.constant 0 : index
    %c0_11 = arith.constant 0 : index
    %14 = vector.load %arg4[%c0_9, %c0_10, %c0_11] : memref<2x8x128xf32, #tpu.memory_space<vmem>>, vector<2x8x128xf32>
    tpu.vector_store %arg4[%c0_9, %c0_10, %c0_11], %13 {strides = array<i32>} : memref<2x8x128xf32, #tpu.memory_space<vmem>>, vector<2x8x128xf32>,
    %c0_12 = arith.constant 0 : index
    %c0_13 = arith.constant 0 : index
    %c0_14 = arith.constant 0 : index
    %15 = vector.load %arg5[%c0_12, %c0_13, %c0_14] : memref<2x8x128xf32, #tpu.memory_space<vmem>>, vector<2x8x128xf32>
    %cst_15 = arith.constant dense<0.000000e+00> : vector<2x8x128xf32>
    %16 = vector.multi_reduction <add>, %10, %cst_15 [1] : vector<2x1x8x128xf32> to vector<2x8x128xf32>
    %17 = arith.addf %15, %16 : vector<2x8x128xf32>
    %c0_16 = arith.constant 0 : index
    %c0_17 = arith.constant 0 : index
    %c0_18 = arith.constant 0 : index
    %18 = vector.load %arg5[%c0_16, %c0_17, %c0_18] : memref<2x8x128xf32, #tpu.memory_space<vmem>>, vector<2x8x128xf32>
    tpu.vector_store %arg5[%c0_16, %c0_17, %c0_18], %17 {strides = array<i32>} : memref<2x8x128xf32, #tpu.memory_space<vmem>>, vector<2x8x128xf32>,
    return
  }
  func.func @transform_0(%arg0: i32, %arg1: i32) -> (i32, i32, i32) {
    %c0_i32 = arith.constant 0 : i32
    %c0_i32_0 = arith.constant 0 : i32
    return %arg0, %arg1, %c0_i32 : i32, i32, i32
  }
  func.func @transform_1(%arg0: i32, %arg1: i32) -> (i32, i32, i32) {
    %c0_i32 = arith.constant 0 : i32
    %c0_i32_0 = arith.constant 0 : i32
    return %arg0, %arg1, %c0_i32 : i32, i32, i32
  }
  func.func @transform_2(%arg0: i32, %arg1: i32) -> (i32, i32, i32) {
    %c0_i32 = arith.constant 0 : i32
    %c0_i32_0 = arith.constant 0 : i32
    %c0_i32_1 = arith.constant 0 : i32
    return %arg0, %c0_i32, %c0_i32_0 : i32, i32, i32
  }
  func.func @transform_3(%arg0: i32, %arg1: i32) -> (i32, i32, i32) {
    %c0_i32 = arith.constant 0 : i32
    %c0_i32_0 = arith.constant 0 : i32
    %c0_i32_1 = arith.constant 0 : i32
    return %arg0, %c0_i32, %c0_i32_0 : i32, i32, i32
  }
}

</mosaic_0001>

<bundles_post_ra>
// kernel: dice_loss.1
= control target key start
LH: loop header
LB: loop body
LE: loop exit
PB: predicated region body
PF: predicated region fallthrough
CT: control target
= control target key end

     0   :  { %s102_s0 = inlined_call_operand.vmem [shape: f32[2,8,128], index: 0, kind: input, shape index: {}]   ;;  %s103_s1 = inlined_call_operand.vmem [shape: f32[2,8,128], index: 1, kind: input, shape index: {}]   ;;  %s104_s2 = inlined_call_operand.vmem [shape: f32[2,8,128], index: 2, kind: output, shape index: {0}]   ;;  %s105_s3 = inlined_call_operand.vmem [shape: f32[2,8,128], index: 3, kind: output, shape index: {1}]  }
   0x1   :  { %v21_v0 = vld [vmem:[%s102_s0] sm:$0xff]  ;;  %v22_v2 = vld [vmem:[%s102_s0 + $0x8] sm:$0xff] }
   0x2   :  { %v23_v1 = vld [vmem:[%s103_s1] sm:$0xff]  ;;  %v24_v4 = vld [vmem:[%s103_s1 + $0x8] sm:$0xff]  ;;  %v27_v5 = vmul.f32 %v21_v0, %v21_v0  ;;  %v28_v7 = vmul.f32 %v22_v2, %v22_v2 }
   0x3   :  { %v25_v3 = vmul.f32 %v23_v1, %v21_v0  ;;  %v29_v6 = vmul.f32 %v23_v1, %v23_v1  ;;  %v26_v8 = vmul.f32 %v24_v4, %v22_v2  ;;  %v30_v9 = vmul.f32 %v24_v4, %v24_v4 }
   0x5   :  { %v31_v10 = vadd.f32 %v29_v6, %v27_v5  ;;  %v32_v11 = vadd.f32 %v30_v9, %v28_v7  ;;  %39 = vst [vmem:[%s104_s2] sm:$0xff] %v25_v3  ;;  %40 = vst [vmem:[%s104_s2 + $0x8] sm:$0xff] %v26_v8 }
   0x7   :  { %47 = vst [vmem:[%s105_s3] sm:$0xff] %v31_v10  ;;  %48 = vst [vmem:[%s105_s3 + $0x8] sm:$0xff] %v32_v11 }

</bundles_post_ra>
